<compile_context>
chip_gen: v6e
topology: v6e:2x2x1
jax: 0.10.0
libtpu: 0.0.40
codegen_flags: <defaults>
</compile_context>

<pallas_src>
import jax
import jax.numpy as jnp
from jax.experimental import pallas as pl
from jax.experimental.pallas import tpu as pltpu


# ---------------------------------------------------------------------------
# Fused kernel: projections + concat/flatten-folded head, all in one body.
# ---------------------------------------------------------------------------
def _fused_mlp_kernel(embed_ref, msa_ref,
                      we_ref, be_ref, wm_ref, bm_ref,
                      w1m_ref, w1e_ref, b1_ref,
                      w2_ref, b2_ref, w3_ref, b3_ref,
                      w4_ref, b4_ref, o_ref):
    def mm(x, w_ref):
        # Cast activations to the (possibly bf16) weight dtype at the MXU input;
        # accumulate + all elementwise math stay in f32 (v5e has no bf16 VPU).
        return jnp.dot(x.astype(w_ref.dtype), w_ref[...],
                       preferred_element_type=jnp.float32)

    # layers[0] / layers[1]: per-token Linear+ReLU via block-diagonal weights.
    out1 = jnp.maximum(mm(embed_ref[...], we_ref) + be_ref[...], 0.0)   # (bb, W*E)
    out2 = jnp.maximum(mm(msa_ref[...],   wm_ref) + bm_ref[...], 0.0)   # (bb, W*M)

    # layers[2]: flat @ w1 with concat/flatten folded into the row-split of w1.
    h = jnp.maximum(mm(out2, w1m_ref) + mm(out1, w1e_ref) + b1_ref[...], 0.0)
    # layers[3], layers[4]
    h = jnp.maximum(mm(h, w2_ref) + b2_ref[...], 0.0)
    h = jnp.maximum(mm(h, w3_ref) + b3_ref[...], 0.0)
    # layers[5]: 16 -> 1 as a VPU reduction (avoids a 16x1 MXU matmul), f32.
    y = jnp.sum(h * w4_ref[...], axis=-1, keepdims=True) + b4_ref[...]
    o_ref[...] = jax.nn.sigmoid(y)


def _pick_row_block(batch, requested=None):
    target = 512 if requested is None else requested
    if batch <= target:
        return batch            # full dim -> always layout-legal
    return max(8, (target // 8) * 8)


# ---------------------------------------------------------------------------
# Wrapper: one-time weight preprocessing + row-tiled pallas_call.
# ---------------------------------------------------------------------------
def mlp_module_forward(params, embed, msa_embed, *, row_block=None,
                       use_bf16_matmul=True):
    B, W, E = embed.shape
    M = msa_embed.shape[-1]

    # Flatten (B, W, F) -> (B, W*F); column index = w*F + f (row-major, free).
    embed2d = embed.reshape(B, W * E)
    msa2d = msa_embed.reshape(B, W * M)

    # --- one-time weight preprocessing (plain JAX, outside the kernel) -------
    # per-token Linear -> block-diagonal matmul over the flattened window
    we_bd = jnp.kron(jnp.eye(W, dtype=params["we"].dtype), params["we"])  # (W*E, W*E)
    wm_bd = jnp.kron(jnp.eye(W, dtype=params["wm"].dtype), params["wm"])  # (W*M, W*M)
    be_t = jnp.tile(params["be"], (1, W))                                 # (1, W*E)
    bm_t = jnp.tile(params["bm"], (1, W))                                 # (1, W*M)

    # Permute w1 rows so the torch.cat((out2, out1), -1) + Flatten disappears:
    # flat column w*(M+E)+c  ->  msa part (c<M) or embed part (c>=M).
    wi = jnp.arange(W)[:, None]
    idx_m = (wi * (M + E) + jnp.arange(M)[None, :]).reshape(-1)
    idx_e = (wi * (M + E) + M + jnp.arange(E)[None, :]).reshape(-1)
    w1_msa = params["w1"][idx_m]          # (W*M, 256)
    w1_emb = params["w1"][idx_e]          # (W*E, 256)
    w2, w3 = params["w2"], params["w3"]
    w4_row = params["w4"].T               # (1, 16), stays f32 (VPU reduction)

    mm_dtype = jnp.bfloat16 if use_bf16_matmul else embed.dtype
    we_bd, wm_bd, w1_msa, w1_emb, w2, w3 = (
        a.astype(mm_dtype) for a in (we_bd, wm_bd, w1_msa, w1_emb, w2, w3))

    # --- grid / specs ---------------------------------------------------------
    block_b = _pick_row_block(B, row_block)
    grid = (pl.cdiv(B, block_b),)

    def row_spec(cols):
        return pl.BlockSpec((block_b, cols), lambda i: (i, 0))

    def resident(a):
        # Constant index map -> fetched once, stays resident in VMEM.
        return pl.BlockSpec(a.shape, lambda i: (0, 0))

    weight_args = (we_bd, be_t, wm_bd, bm_t,
                   w1_msa, w1_emb, params["b1"],
                   w2, params["b2"], w3, params["b3"],
                   w4_row, params["b4"])

    out = pl.pallas_call(
        _fused_mlp_kernel,
        out_shape=jax.ShapeDtypeStruct((B, 1), jnp.float32),
        grid=grid,
        in_specs=[row_spec(W * E), row_spec(W * M)]
                 + [resident(a) for a in weight_args],
        out_specs=pl.BlockSpec((block_b, 1), lambda i: (i, 0)),
        compiler_params=pltpu.CompilerParams(
            dimension_semantics=("parallel",),          # v7x: shard rows on 2 TCs
            vmem_limit_bytes=32 * 1024 * 1024),         # safe on v5e/v6e/v7x
    )(embed2d, msa2d, *weight_args)
    return out


# ---------------------------------------------------------------------------
# Deterministic parameter init (PyTorch Linear default: U(-1/sqrt(fan_in), ...))
# Weights stored as (in, out) so y = x @ W + b  ==  torch x @ W.T + b.
# ---------------------------------------------------------------------------
def init_params(key, half_window, embedding_size, msa_size):
    window = 2 * half_window + 1
    dims = [
        (embedding_size, embedding_size),                       # layers[0]
        (msa_size, msa_size),                                   # layers[1]
        ((embedding_size + msa_size) * window, 256),            # layers[2]
        (256, 128),                                             # layers[3]
        (128, 16),                                              # layers[4]
        (16, 1),                                                # layers[5]
    ]
    names = [("we", "be"), ("wm", "bm"), ("w1", "b1"),
             ("w2", "b2"), ("w3", "b3"), ("w4", "b4")]
    params = {}
    for (fan_in, fan_out), (wn, bn) in zip(dims, names):
        key, kw, kb = jax.random.split(key, 3)
        bound = 1.0 / float(fan_in) ** 0.5
        params[wn] = jax.random.uniform(kw, (fan_in, fan_out), jnp.float32,
                                        minval=-bound, maxval=bound)
        params[bn] = jax.random.uniform(kb, (1, fan_out), jnp.float32,
                                        minval=-bound, maxval=bound)
    return params


# Pure-JAX reference (mirrors the PyTorch forward exactly).
def _reference(params, embed, msa_embed):
    out1 = jnp.maximum(embed @ params["we"] + params["be"], 0.0)
    out2 = jnp.maximum(msa_embed @ params["wm"] + params["bm"], 0.0)
    out = jnp.concatenate([out2, out1], axis=-1)
    out = out.reshape(out.shape[0], -1)
    out = jnp.maximum(out @ params["w1"] + params["b1"], 0.0)
    out = jnp.maximum(out @ params["w2"] + params["b2"], 0.0)
    out = jnp.maximum(out @ params["w3"] + params["b3"], 0.0)
    out = jax.nn.sigmoid(out @ params["w4"] + params["b4"])
    return out


if __name__ == "__main__":
    half_window = 1          # window = 3
    embedding_size = 32
    msa_size = 16
    batch = 16
    window = 2 * half_window + 1

    key = jax.random.PRNGKey(0)
    kp, ke, km = jax.random.split(key, 3)
    params = init_params(kp, half_window, embedding_size, msa_size)

    embed = jax.random.normal(ke, (batch, window, embedding_size), jnp.float32)
    msa_embed = jax.random.normal(km, (batch, window, msa_size), jnp.float32)

    ref = _reference(params, embed, msa_embed)

    # f32-at-MXU path: checks the fusion algebra (block-diag + w1 permutation).
    # row_block=8 -> grid of 2, exercising pipelining + resident weights.
    out_f32 = mlp_module_forward(params, embed, msa_embed,
                                 row_block=8, use_bf16_matmul=False)
    out_f32 = jax.block_until_ready(out_f32)
    assert out_f32.shape == (batch, 1), out_f32.shape
    assert jnp.allclose(out_f32, ref, atol=1e-4, rtol=1e-4), (out_f32, ref)

    # Default bf16-at-MXU path: looser tolerance vs the pure-f32 reference.
    out_bf16 = mlp_module_forward(params, embed, msa_embed, row_block=8)
    out_bf16 = jax.block_until_ready(out_bf16)
    assert out_bf16.shape == (batch, 1), out_bf16.shape
    assert jnp.allclose(out_bf16, ref, atol=3e-2, rtol=0.0), (out_bf16, ref)

    print("KERNEL_OK")
</pallas_src>

<mosaic_0001>
module attributes {stable_mosaic.version = 11 : i64} {
  func.func @_fused_mlp_kernel(%arg0: i32, %arg1: memref<8x96xf32, #tpu.memory_space<vmem>>, %arg2: memref<8x48xf32, #tpu.memory_space<vmem>>, %arg3: memref<96x96xf32, #tpu.memory_space<vmem>>, %arg4: memref<1x96xf32, #tpu.memory_space<vmem>>, %arg5: memref<48x48xf32, #tpu.memory_space<vmem>>, %arg6: memref<1x48xf32, #tpu.memory_space<vmem>>, %arg7: memref<48x256xf32, #tpu.memory_space<vmem>>, %arg8: memref<96x256xf32, #tpu.memory_space<vmem>>, %arg9: memref<1x256xf32, #tpu.memory_space<vmem>>, %arg10: memref<256x128xf32, #tpu.memory_space<vmem>>, %arg11: memref<1x128xf32, #tpu.memory_space<vmem>>, %arg12: memref<128x16xf32, #tpu.memory_space<vmem>>, %arg13: memref<1x16xf32, #tpu.memory_space<vmem>>, %arg14: memref<1x16xf32, #tpu.memory_space<vmem>>, %arg15: memref<1x1xf32, #tpu.memory_space<vmem>>, %arg16: memref<8x1xf32, #tpu.memory_space<vmem>>) attributes {dimension_semantics = [#tpu.dimension_semantics<parallel>], iteration_bounds = array<i64: 2>, scalar_prefetch = 0 : i64, scratch_operands = 0 : i64, tpu.core_type = #tpu.core_type<tc>, window_params = [{transform_indices = @transform_0, window_bounds = array<i64: 8, 96>}, {transform_indices = @transform_1, window_bounds = array<i64: 8, 48>}, {pipeline_mode = #tpu.pipeline_mode<synchronous>, transform_indices = @transform_2, window_bounds = array<i64: 96, 96>}, {pipeline_mode = #tpu.pipeline_mode<synchronous>, transform_indices = @transform_3, window_bounds = array<i64: 1, 96>}, {pipeline_mode = #tpu.pipeline_mode<synchronous>, transform_indices = @transform_4, window_bounds = array<i64: 48, 48>}, {pipeline_mode = #tpu.pipeline_mode<synchronous>, transform_indices = @transform_5, window_bounds = array<i64: 1, 48>}, {pipeline_mode = #tpu.pipeline_mode<synchronous>, transform_indices = @transform_6, window_bounds = array<i64: 48, 256>}, {pipeline_mode = #tpu.pipeline_mode<synchronous>, transform_indices = @transform_7, window_bounds = array<i64: 96, 256>}, {pipeline_mode = #tpu.pipeline_mode<synchronous>, transform_indices = @transform_8, window_bounds = array<i64: 1, 256>}, {pipeline_mode = #tpu.pipeline_mode<synchronous>, transform_indices = @transform_9, window_bounds = array<i64: 256, 128>}, {pipeline_mode = #tpu.pipeline_mode<synchronous>, transform_indices = @transform_10, window_bounds = array<i64: 1, 128>}, {pipeline_mode = #tpu.pipeline_mode<synchronous>, transform_indices = @transform_11, window_bounds = array<i64: 128, 16>}, {pipeline_mode = #tpu.pipeline_mode<synchronous>, transform_indices = @transform_12, window_bounds = array<i64: 1, 16>}, {pipeline_mode = #tpu.pipeline_mode<synchronous>, transform_indices = @transform_13, window_bounds = array<i64: 1, 16>}, {pipeline_mode = #tpu.pipeline_mode<synchronous>, transform_indices = @transform_14, window_bounds = array<i64: 1, 1>}, {transform_indices = @transform_15, window_bounds = array<i64: 8, 1>}]} {
    %c0 = arith.constant 0 : index
    %c0_0 = arith.constant 0 : index
    %0 = vector.load %arg1[%c0, %c0_0] : memref<8x96xf32, #tpu.memory_space<vmem>>, vector<8x96xf32>
    %c0_1 = arith.constant 0 : index
    %c0_2 = arith.constant 0 : index
    %1 = vector.load %arg3[%c0_1, %c0_2] : memref<96x96xf32, #tpu.memory_space<vmem>>, vector<96x96xf32>
    %cst = arith.constant dense<0.000000e+00> : vector<8x96xf32>
    %2 = tpu.matmul %0, %1, %cst {dimension_numbers = #tpu.dot_dimension_numbers<[1], [0], [0], [1], [0, 0, 1, 1], [], []>} : vector<8x96xf32>, vector<96x96xf32>, vector<8x96xf32> -> vector<8x96xf32>
    %c0_3 = arith.constant 0 : index
    %c0_4 = arith.constant 0 : index
    %3 = vector.load %arg4[%c0_3, %c0_4] : memref<1x96xf32, #tpu.memory_space<vmem>>, vector<1x96xf32>
    %4 = vector.broadcast %3 : vector<1x96xf32> to vector<8x96xf32>
    %5 = arith.addf %2, %4 : vector<8x96xf32>
    %cst_5 = arith.constant 0.000000e+00 : f32
    %6 = vector.broadcast %cst_5 : f32 to vector<8x96xf32>
    %7 = arith.maximumf %5, %6 : vector<8x96xf32>
    %c0_6 = arith.constant 0 : index
    %c0_7 = arith.constant 0 : index
    %8 = vector.load %arg2[%c0_6, %c0_7] : memref<8x48xf32, #tpu.memory_space<vmem>>, vector<8x48xf32>
    %c0_8 = arith.constant 0 : index
    %c0_9 = arith.constant 0 : index
    %9 = vector.load %arg5[%c0_8, %c0_9] : memref<48x48xf32, #tpu.memory_space<vmem>>, vector<48x48xf32>
    %cst_10 = arith.constant dense<0.000000e+00> : vector<8x48xf32>
    %10 = tpu.matmul %8, %9, %cst_10 {dimension_numbers = #tpu.dot_dimension_numbers<[1], [0], [0], [1], [0, 0, 1, 1], [], []>} : vector<8x48xf32>, vector<48x48xf32>, vector<8x48xf32> -> vector<8x48xf32>
    %c0_11 = arith.constant 0 : index
    %c0_12 = arith.constant 0 : index
    %11 = vector.load %arg6[%c0_11, %c0_12] : memref<1x48xf32, #tpu.memory_space<vmem>>, vector<1x48xf32>
    %12 = vector.broadcast %11 : vector<1x48xf32> to vector<8x48xf32>
    %13 = arith.addf %10, %12 : vector<8x48xf32>
    %cst_13 = arith.constant 0.000000e+00 : f32
    %14 = vector.broadcast %cst_13 : f32 to vector<8x48xf32>
    %15 = arith.maximumf %13, %14 : vector<8x48xf32>
    %c0_14 = arith.constant 0 : index
    %c0_15 = arith.constant 0 : index
    %16 = vector.load %arg7[%c0_14, %c0_15] : memref<48x256xf32, #tpu.memory_space<vmem>>, vector<48x256xf32>
    %cst_16 = arith.constant dense<0.000000e+00> : vector<8x256xf32>
    %17 = tpu.matmul %15, %16, %cst_16 {dimension_numbers = #tpu.dot_dimension_numbers<[1], [0], [0], [1], [0, 0, 1, 1], [], []>} : vector<8x48xf32>, vector<48x256xf32>, vector<8x256xf32> -> vector<8x256xf32>
    %c0_17 = arith.constant 0 : index
    %c0_18 = arith.constant 0 : index
    %18 = vector.load %arg8[%c0_17, %c0_18] : memref<96x256xf32, #tpu.memory_space<vmem>>, vector<96x256xf32>
    %cst_19 = arith.constant dense<0.000000e+00> : vector<8x256xf32>
    %19 = tpu.matmul %7, %18, %cst_19 {dimension_numbers = #tpu.dot_dimension_numbers<[1], [0], [0], [1], [0, 0, 1, 1], [], []>} : vector<8x96xf32>, vector<96x256xf32>, vector<8x256xf32> -> vector<8x256xf32>
    %20 = arith.addf %17, %19 : vector<8x256xf32>
    %c0_20 = arith.constant 0 : index
    %c0_21 = arith.constant 0 : index
    %21 = vector.load %arg9[%c0_20, %c0_21] : memref<1x256xf32, #tpu.memory_space<vmem>>, vector<1x256xf32>
    %22 = vector.broadcast %21 : vector<1x256xf32> to vector<8x256xf32>
    %23 = arith.addf %20, %22 : vector<8x256xf32>
    %cst_22 = arith.constant 0.000000e+00 : f32
    %24 = vector.broadcast %cst_22 : f32 to vector<8x256xf32>
    %25 = arith.maximumf %23, %24 : vector<8x256xf32>
    %c0_23 = arith.constant 0 : index
    %c0_24 = arith.constant 0 : index
    %26 = vector.load %arg10[%c0_23, %c0_24] : memref<256x128xf32, #tpu.memory_space<vmem>>, vector<256x128xf32>
    %cst_25 = arith.constant dense<0.000000e+00> : vector<8x128xf32>
    %27 = tpu.matmul %25, %26, %cst_25 {dimension_numbers = #tpu.dot_dimension_numbers<[1], [0], [0], [1], [0, 0, 1, 1], [], []>} : vector<8x256xf32>, vector<256x128xf32>, vector<8x128xf32> -> vector<8x128xf32>
    %c0_26 = arith.constant 0 : index
    %c0_27 = arith.constant 0 : index
    %28 = vector.load %arg11[%c0_26, %c0_27] : memref<1x128xf32, #tpu.memory_space<vmem>>, vector<1x128xf32>
    %29 = vector.broadcast %28 : vector<1x128xf32> to vector<8x128xf32>
    %30 = arith.addf %27, %29 : vector<8x128xf32>
    %cst_28 = arith.constant 0.000000e+00 : f32
    %31 = vector.broadcast %cst_28 : f32 to vector<8x128xf32>
    %32 = arith.maximumf %30, %31 : vector<8x128xf32>
    %c0_29 = arith.constant 0 : index
    %c0_30 = arith.constant 0 : index
    %33 = vector.load %arg12[%c0_29, %c0_30] : memref<128x16xf32, #tpu.memory_space<vmem>>, vector<128x16xf32>
    %cst_31 = arith.constant dense<0.000000e+00> : vector<8x16xf32>
    %34 = tpu.matmul %32, %33, %cst_31 {dimension_numbers = #tpu.dot_dimension_numbers<[1], [0], [0], [1], [0, 0, 1, 1], [], []>} : vector<8x128xf32>, vector<128x16xf32>, vector<8x16xf32> -> vector<8x16xf32>
    %c0_32 = arith.constant 0 : index
    %c0_33 = arith.constant 0 : index
    %35 = vector.load %arg13[%c0_32, %c0_33] : memref<1x16xf32, #tpu.memory_space<vmem>>, vector<1x16xf32>
    %36 = vector.broadcast %35 : vector<1x16xf32> to vector<8x16xf32>
    %37 = arith.addf %34, %36 : vector<8x16xf32>
    %cst_34 = arith.constant 0.000000e+00 : f32
    %38 = vector.broadcast %cst_34 : f32 to vector<8x16xf32>
    %39 = arith.maximumf %37, %38 : vector<8x16xf32>
    %c0_35 = arith.constant 0 : index
    %c0_36 = arith.constant 0 : index
    %40 = vector.load %arg14[%c0_35, %c0_36] : memref<1x16xf32, #tpu.memory_space<vmem>>, vector<1x16xf32>
    %41 = vector.broadcast %40 : vector<1x16xf32> to vector<8x16xf32>
    %42 = arith.mulf %39, %41 : vector<8x16xf32>
    %cst_37 = arith.constant dense<0.000000e+00> : vector<8xf32>
    %43 = vector.multi_reduction <add>, %42, %cst_37 [1] : vector<8x16xf32> to vector<8xf32>
    %44 = vector.shape_cast %43 : vector<8xf32> to vector<8x1xf32>
    %c0_38 = arith.constant 0 : index
    %c0_39 = arith.constant 0 : index
    %45 = vector.load %arg15[%c0_38, %c0_39] : memref<1x1xf32, #tpu.memory_space<vmem>>, vector<1x1xf32>
    %46 = vector.broadcast %45 : vector<1x1xf32> to vector<8x1xf32>
    %47 = arith.addf %44, %46 : vector<8x1xf32>
    %48 = arith.negf %47 : vector<8x1xf32>
    %49 = math.exp %48 : vector<8x1xf32>
    %cst_40 = arith.constant 1.000000e+00 : f32
    %50 = vector.broadcast %cst_40 : f32 to vector<8x1xf32>
    %51 = arith.addf %50, %49 : vector<8x1xf32>
    %52 = arith.divf %50, %51 : vector<8x1xf32>
    %c0_41 = arith.constant 0 : index
    %c0_42 = arith.constant 0 : index
    %53 = vector.load %arg16[%c0_41, %c0_42] : memref<8x1xf32, #tpu.memory_space<vmem>>, vector<8x1xf32>
    tpu.vector_store %arg16[%c0_41, %c0_42], %52 {strides = array<i32>} : memref<8x1xf32, #tpu.memory_space<vmem>>, vector<8x1xf32>,
    return
  }
  func.func @transform_0(%arg0: i32) -> (i32, i32) {
    %c0_i32 = arith.constant 0 : i32
    %c0_i32_0 = arith.constant 0 : i32
    return %arg0, %c0_i32 : i32, i32
  }
  func.func @transform_1(%arg0: i32) -> (i32, i32) {
    %c0_i32 = arith.constant 0 : i32
    %c0_i32_0 = arith.constant 0 : i32
    return %arg0, %c0_i32 : i32, i32
  }
  func.func @transform_2(%arg0: i32) -> (i32, i32) {
    %c0_i32 = arith.constant 0 : i32
    %c0_i32_0 = arith.constant 0 : i32
    %c0_i32_1 = arith.constant 0 : i32
    return %c0_i32, %c0_i32_0 : i32, i32
  }
  func.func @transform_3(%arg0: i32) -> (i32, i32) {
    %c0_i32 = arith.constant 0 : i32
    %c0_i32_0 = arith.constant 0 : i32
    %c0_i32_1 = arith.constant 0 : i32
    return %c0_i32, %c0_i32_0 : i32, i32
  }
  func.func @transform_4(%arg0: i32) -> (i32, i32) {
    %c0_i32 = arith.constant 0 : i32
    %c0_i32_0 = arith.constant 0 : i32
    %c0_i32_1 = arith.constant 0 : i32
    return %c0_i32, %c0_i32_0 : i32, i32
  }
  func.func @transform_5(%arg0: i32) -> (i32, i32) {
    %c0_i32 = arith.constant 0 : i32
    %c0_i32_0 = arith.constant 0 : i32
    %c0_i32_1 = arith.constant 0 : i32
    return %c0_i32, %c0_i32_0 : i32, i32
  }
  func.func @transform_6(%arg0: i32) -> (i32, i32) {
    %c0_i32 = arith.constant 0 : i32
    %c0_i32_0 = arith.constant 0 : i32
    %c0_i32_1 = arith.constant 0 : i32
    return %c0_i32, %c0_i32_0 : i32, i32
  }
  func.func @transform_7(%arg0: i32) -> (i32, i32) {
    %c0_i32 = arith.constant 0 : i32
    %c0_i32_0 = arith.constant 0 : i32
    %c0_i32_1 = arith.constant 0 : i32
    return %c0_i32, %c0_i32_0 : i32, i32
  }
  func.func @transform_8(%arg0: i32) -> (i32, i32) {
    %c0_i32 = arith.constant 0 : i32
    %c0_i32_0 = arith.constant 0 : i32
    %c0_i32_1 = arith.constant 0 : i32
    return %c0_i32, %c0_i32_0 : i32, i32
  }
  func.func @transform_9(%arg0: i32) -> (i32, i32) {
    %c0_i32 = arith.constant 0 : i32
    %c0_i32_0 = arith.constant 0 : i32
    %c0_i32_1 = arith.constant 0 : i32
    return %c0_i32, %c0_i32_0 : i32, i32
  }
  func.func @transform_10(%arg0: i32) -> (i32, i32) {
    %c0_i32 = arith.constant 0 : i32
    %c0_i32_0 = arith.constant 0 : i32
    %c0_i32_1 = arith.constant 0 : i32
    return %c0_i32, %c0_i32_0 : i32, i32
  }
  func.func @transform_11(%arg0: i32) -> (i32, i32) {
    %c0_i32 = arith.constant 0 : i32
    %c0_i32_0 = arith.constant 0 : i32
    %c0_i32_1 = arith.constant 0 : i32
    return %c0_i32, %c0_i32_0 : i32, i32
  }
  func.func @transform_12(%arg0: i32) -> (i32, i32) {
    %c0_i32 = arith.constant 0 : i32
    %c0_i32_0 = arith.constant 0 : i32
    %c0_i32_1 = arith.constant 0 : i32
    return %c0_i32, %c0_i32_0 : i32, i32
  }
  func.func @transform_13(%arg0: i32) -> (i32, i32) {
    %c0_i32 = arith.constant 0 : i32
    %c0_i32_0 = arith.constant 0 : i32
    %c0_i32_1 = arith.constant 0 : i32
    return %c0_i32, %c0_i32_0 : i32, i32
  }
  func.func @transform_14(%arg0: i32) -> (i32, i32) {
    %c0_i32 = arith.constant 0 : i32
    %c0_i32_0 = arith.constant 0 : i32
    %c0_i32_1 = arith.constant 0 : i32
    return %c0_i32, %c0_i32_0 : i32, i32
  }
  func.func @transform_15(%arg0: i32) -> (i32, i32) {
    %c0_i32 = arith.constant 0 : i32
    %c0_i32_0 = arith.constant 0 : i32
    return %arg0, %c0_i32 : i32, i32
  }
}

</mosaic_0001>

<bundles_post_ra>
// kernel: tpu_custom_call.1
= control target key start
LH: loop header
LB: loop body
LE: loop exit
PB: predicated region body
PF: predicated region fallthrough
CT: control target
= control target key end

     0   :  { %s2225_s0 = inlined_call_operand.hbm [shape: f32[16,96], index: 0, kind: input, shape index: {}]   ;;  %s2226_s1 = inlined_call_operand.hbm [shape: f32[16,48], index: 1, kind: input, shape index: {}]   ;;  %s2227_s2 = inlined_call_operand.vmem [shape: f32[96,96], index: 2, kind: input, shape index: {}]   ;;  %s2228_s3 = inlined_call_operand.vmem [shape: f32[1,96], index: 3, kind: input, shape index: {}]   ;;  %s2229_s4 = inlined_call_operand.vmem [shape: f32[48,48], index: 4, kind: input, shape index: {}]   ;;  %s2230_s5 = inlined_call_operand.vmem [shape: f32[1,48], index: 5, kind: input, shape index: {}]   ;;  %s2231_s6 = inlined_call_operand.hbm [shape: f32[48,256], index: 6, kind: input, shape index: {}]   ;;  %s2232_s7 = inlined_call_operand.hbm [shape: f32[96,256], index: 7, kind: input, shape index: {}]   ;;  %s2233_s8 = inlined_call_operand.vmem [shape: f32[1,256], index: 8, kind: input, shape index: {}]   ;;  %s2234_s9 = inlined_call_operand.hbm [shape: f32[256,128], index: 9, kind: input, shape index: {}]   ;;  %s2235_s10 = inlined_call_operand.vmem [shape: f32[1,128], index: 10, kind: input, shape index: {}]   ;;  %s2236_s11 = inlined_call_operand.vmem [shape: f32[128,16], index: 11, kind: input, shape index: {}]   ;;  %s2237_s12 = inlined_call_operand.vmem [shape: f32[1,16], index: 12, kind: input, shape index: {}]   ;;  %s2238_s13 = inlined_call_operand.vmem [shape: f32[1,16], index: 13, kind: input, shape index: {}]   ;;  %s2239_s14 = inlined_call_operand.<no memory space> [shape: f32[1,1], index: 14, kind: input, shape index: {}]   ;;  %s2240_s15 = inlined_call_operand.vmem [shape: f32[16,1], index: 15, kind: output, shape index: {}]  }
   0x1   :  { %2247 = sst [smem:[#allocation18_spill]] %s2231_s6  ;;  %v20_v0 = vstv %s2239_s14 }
   0x2   :  { %2248 = sst [smem:[#allocation19_spill]] %s2232_s7  ;;  %21 = vst [vmem:[#allocation2] sm:$0x1] %v20_v0 }
   0x3   :  { %2249 = sst [smem:[#allocation20_spill]] %s2234_s9 }
   0x4   :  { %2250 = sst [smem:[#allocation21_spill]] %s2238_s13 }
   0x5   :  { %2251 = sst [smem:[#allocation22_spill]] %s2240_s15 }
   0x6   :  { %22 = vsyncpa [#allocation4], 0 }
   0x7   :  { %24 = vsyncpa [#allocation4 + $0x1], 0 }
   0x8   :  { %25 = vsyncpa [#allocation6], 0 }
   0x9   :  { %27 = vsyncpa [#allocation6 + $0x1], 0 }
   0xa   :  { %28 = vsyncpa [#allocation9], 0  ;;  %s1864_s20 = smov 0   ;;  %s1866_s21 = smov 0  }
   0xb   :  { %s1868_s22 = smov 0   ;;  %s1870_s23 = smov 0  }
   0xc LB: > { %2252 = sst [smem:[#allocation15_spill]] %s1764_s22  ;;  %s1883_s14 = sadd.s32 4294967295, %s1768_s23   ;;  %s1768_s23 = sphi %s1870_s23, %s2270_s23   ;;  %s1764_s22 = sphi %s1868_s22, %s2272_s22   ;;  %s1760_s21 = sphi %s1866_s21, %s2274_s21   ;;  %s1756_s20 = sphi %s1864_s20, %s2273_s20  }
   0xd   : > { %p54_p0 = scmp.ne.s32.totalorder %s1760_s21, %s1756_s20  ;;  %p2241_p1 = scmp.eq.s32.totalorder %s1883_s14, 0 }
   0xe   : > { %p1325_p2 = scmp.ge.s32.totalorder %s1768_s23, 1  ;;  %p390_p3 = scmp.lt.s32.totalorder %s1768_s23, 3 }
   0xf   : > { %p1891_p4 = por %p2241_p1, %p54_p0  ;;  %s1770_s26 = smov [#allocation7]  }
  0x10   : > { %p1895_p5 = pnand %p1325_p2, %p390_p3  ;;  %s414_s27 = sshll.u32 %s1770_s26, 4  ;;  %s415_s27 = int_to_ptr.vmem [resolvable:$true] %s414_s27 }
  0x11   : > { %s2253_s24 = scalar_select %p1891_p4, 1, 0 }
  0x12   : > { %s2254_s25 = scalar_select %p1895_p5, 1, 0 }
  0x13   : > { %p1519_p6 = pneg %p1895_p5  ;;  %s1771_s29 = smov [#allocation8]  }
  0x14   : > { %s427_s30 = sshll.u32 %s1771_s29, 4  ;;  %s1772_s16 = smov [#allocation10]   ;;  %s428_s30 = int_to_ptr.vmem [resolvable:$true] %s427_s30 }
  0x15   : > { %p1903_p7 = pnand %p1519_p6, %p2241_p1  ;;  %s443_s17 = sshll.u32 %s1772_s16, 4  ;;  %s444_s17 = int_to_ptr.vmem [resolvable:$true] %s443_s17 }
  0x16   : > { %s1599_s18 = scalar_lea.vmem %s415_s27, 1536  ;;  %p1607_p12 = scmp.lt.s32.totalorder %s415_s27, %s415_s27 }
  0x17   : > { %p1590_p8 = pneg %p1903_p7  ;;  %p1600_p9 = scmp.ne.s32.totalorder %s415_s27, %s1599_s18 }
  0x18   : > { %p1608_p13 = scmp.lt.s32.totalorder %s1599_s18, %s1599_s18 }
  0x19   : > { %p1602_p10 = pnand %p1600_p9, %p1590_p8 }
  0x1a   : > { %p1609_p0 = por %p1608_p13, %p1607_p12 }
  0x1b   : > { %p1603_p11 = pneg %p1602_p10 }
  0x1d   : > { %p1610_p2 = pnand %p1609_p0, %p1603_p11 }
  0x1f   : > { %1613 = shalt.err (!%p1610_p2)
}
  0x20   : > { %s1773_s19 = smov 256   ;;  %s1774_s20 = smov 16  }
  0x21   : > { %s2256_s6 = sld [smem:[#allocation18_spill]]  ;;  %s1625_s16 = scalar_lea.vmem %s428_s30, 3072 }
  0x22   : > { %p1626_p3 = scmp.ne.s32.totalorder %s428_s30, %s1625_s16  ;;  %p1633_p10 = scmp.lt.s32.totalorder %s428_s30, %s428_s30 }
  0x23   : > { %p1634_p1 = scmp.lt.s32.totalorder %s1625_s16, %s1625_s16 }
  0x24   : > { %p1628_p6 = pnand %p1626_p3, %p1590_p8 }
  0x25   : > { %p1635_p12 = por %p1634_p1, %p1633_p10 }
  0x26   : > { %p1629_p9 = pneg %p1628_p6 }
  0x27   : > { %1522 = dma.hbm_to_vmem [thread:$0]  (!%p1903_p7), %s2256_s6, 1536, %s415_s27, [#allocation6], %s1773_s19, %s1773_s19, %s1774_s20  }
  0x28   : > { %p1636_p11 = pnand %p1635_p12, %p1629_p9 }
  0x2a   : > { %1639 = shalt.err (!%p1636_p11)
}
  0x2b   : > { %s2257_s7 = sld [smem:[#allocation19_spill]]  ;;  %s1651_s27 = scalar_lea.vmem %s444_s17, 4096 }
  0x2c   : > { %p1652_p13 = scmp.ne.s32.totalorder %s444_s17, %s1651_s27  ;;  %p1659_p3 = scmp.lt.s32.totalorder %s444_s17, %s444_s17 }
  0x2d   : > { %p1660_p6 = scmp.lt.s32.totalorder %s1651_s27, %s1651_s27 }
  0x2e   : > { %p1654_p0 = pnand %p1652_p13, %p1590_p8 }
  0x2f   : > { %p1661_p4 = por %p1660_p6, %p1659_p3 }
  0x30   : > { %p1655_p2 = pneg %p1654_p0 }
  0x31   : > { %1525 = dma.hbm_to_vmem [thread:$0]  (!%p1903_p7), %s2257_s7, 3072, %s428_s30, [#allocation9], %s1773_s19, %s1773_s19, %s1774_s20  }
  0x32   : > { %p1662_p1 = pnand %p1661_p4, %p1655_p2 }
  0x34   : > { %1665 = shalt.err (!%p1662_p1)
}
  0x35   : > { %s1775_s26 = smov 128   ;;  %s1776_s15 = smov 8  }
  0x36   : > { %s2258_s9 = sld [smem:[#allocation20_spill]]  ;;  %s1934_s20 = sadd.s32 1, %s1768_s23  }
  0x37   : > { %2259 = sst [smem:[#allocation16_spill]] %s1934_s20  ;;  %s38_s29 = ssub.s32 %s1768_s23, %s1934_s20 }
  0x38   : > { %s41_s16 = sadd.s32 1, %s1764_s22  ;;  %p39_p4 = scmp.eq.s32.totalorder %s38_s29, 0 }
  0x39   : > { %p48_p8 = scmp.ne.s32.totalorder %s1764_s22, %s1760_s21  ;;  %p49_p9 = scmp.eq.s32.totalorder %s1768_s23, 0 }
  0x3a   : > { %p1539_p10 = scmp.lt.s32.totalorder %s1768_s23, 2  ;;  %s472_s27 = sand.u32 1, %s1764_s22  }
  0x3b   : > { %s1944_s18 = scalar_select %p39_p4, %s1764_s22, %s41_s16  }
  0x3c   : > { %1528 = dma.hbm_to_vmem [thread:$0]  (!%p1903_p7), %s2258_s9, 4096, %s444_s17, [#allocation9], %s1775_s26, %s1775_s26, %s1776_s15  }
  0x3d   : > { %2260 = sst [smem:[#allocation17_spill]] %s1944_s18  ;;  %p50_p12 = por %p49_p9, %p48_p8 }
  0x3e   : > { %s1947_s6 = sshll.u32 %s472_s27, 3  ;;  %s1331_s28 = sshll.u32 %s1768_s23, 7 }
  0x3f   : > { %s1953_s26 = scalar_lea.hbm %s2225_s0, %s1331_s28  ;;  %s476_s15 = scalar_lea.vmem [#allocation3], %s1947_s6 }
  0x40   : > { %s483_s19 = sshll.u32 %s476_s15, 4  ;;  %p1958_p7 = pnand %p1539_p10, %p50_p12  ;;  %s1956_s19 = int_to_ptr.vmem [resolvable:$true] %s483_s19 }
  0x41   : > { %s1965_s9 = scalar_lea.hbm %s2226_s1, %s1331_s28  ;;  %s490_s30 = sand.u32 1, %s1768_s23  }
  0x42   : > { %s473_s17 = scalar_lea.sflag [#allocation4], %s472_s27  ;;  %s1666_s18 = scalar_lea.hbm %s1953_s26, 128 }
  0x43   : > { %p1667_p11 = scmp.ne.s32.totalorder %s1953_s26, %s1666_s18  ;;  %p1668_p13 = pneg %p1958_p7 }
  0x44   : > { %s1671_s20 = scalar_lea.hbm %s2225_s0, 256  ;;  %p1672_p3 = scmp.lt.s32.totalorder %s1953_s26, %s2225_s0 }
  0x45   : > { %p1669_p0 = pnand %p1668_p13, %p1667_p11  ;;  %p1673_p6 = scmp.lt.s32.totalorder %s1671_s20, %s1666_s18 }
  0x47   : > { %p1670_p2 = pneg %p1669_p0  ;;  %p1674_p1 = por %p1673_p6, %p1672_p3 }
  0x49   : > { %p1675_p4 = pnand %p1674_p1, %p1670_p2 }
  0x4b   : > { %1678 = shalt.err (!%p1675_p4)
}
  0x4c   : > { %s1679_s27 = scalar_lea.vmem %s1956_s19, 128  ;;  %s1777_s22 = smov [#allocation3]  }
  0x4d   : > { %p1680_p8 = scmp.ne.s32.totalorder %s1956_s19, %s1679_s27  ;;  %s1684_s28 = sshll.u32 %s1777_s22, 4  ;;  %s1685_s28 = int_to_ptr.vmem [resolvable:$false] %s1684_s28 }
  0x4e   : > { %s1686_s16 = scalar_lea.vmem %s1685_s28, 256  ;;  %p1687_p12 = scmp.lt.s32.totalorder %s1956_s19, %s1685_s28 }
  0x4f   : > { %p1682_p9 = pnand %p1680_p8, %p1668_p13  ;;  %p1688_p11 = scmp.lt.s32.totalorder %s1686_s16, %s1679_s27 }
  0x51   : > { %p1683_p10 = pneg %p1682_p9  ;;  %p1689_p0 = por %p1688_p11, %p1687_p12 }
  0x53   : > { %p1690_p3 = pnand %p1689_p0, %p1683_p10 }
  0x55   : > { %1693 = shalt.err (!%p1690_p3)
}
  0x56   : > { %1532 = dma.hbm_to_vmem [thread:$0]  (!%p1958_p7), %s1953_s26, 128, %s1956_s19, %s473_s17  }
  0x57   : > { %s494_s13 = scalar_lea.vmem [#allocation5], %s1947_s6  ;;  %s491_s18 = scalar_lea.sflag [#allocation6], %s490_s30 }
  0x58   : > { %s501_s20 = sshll.u32 %s494_s13, 4  ;;  %s1694_s15 = scalar_lea.hbm %s1965_s9, 128  ;;  %s502_s20 = int_to_ptr.vmem [resolvable:$true] %s501_s20 }
  0x59   : > { %p1695_p2 = scmp.ne.s32.totalorder %s1965_s9, %s1694_s15  ;;  %s1699_s22 = scalar_lea.hbm %s2226_s1, 256 }
  0x5a   : > { %p1700_p4 = scmp.lt.s32.totalorder %s1965_s9, %s2226_s1  ;;  %p1701_p8 = scmp.lt.s32.totalorder %s1699_s22, %s1694_s15 }
  0x5b   : > { %p1697_p6 = pnand %p1695_p2, %p1668_p13 }
  0x5c   : > { %p1702_p9 = por %p1701_p8, %p1700_p4 }
  0x5d   : > { %p1698_p1 = pneg %p1697_p6 }
  0x5f   : > { %p1703_p10 = pnand %p1702_p9, %p1698_p1 }
  0x61   : > { %1706 = shalt.err (!%p1703_p10)
}
  0x62   : > { %s1707_s6 = scalar_lea.vmem %s502_s20, 128  ;;  %s1778_s23 = smov [#allocation5]  }
  0x63   : > { %p1708_p12 = scmp.ne.s32.totalorder %s502_s20, %s1707_s6  ;;  %s1712_s26 = sshll.u32 %s1778_s23, 4  ;;  %s1713_s26 = int_to_ptr.vmem [resolvable:$false] %s1712_s26 }
  0x64   : > { %s1714_s19 = scalar_lea.vmem %s1713_s26, 256  ;;  %p1715_p3 = scmp.lt.s32.totalorder %s502_s20, %s1713_s26 }
  0x65   : > { %p1710_p11 = pnand %p1708_p12, %p1668_p13  ;;  %p1716_p2 = scmp.lt.s32.totalorder %s1714_s19, %s1707_s6 }
  0x67   : > { %p1711_p0 = pneg %p1710_p11  ;;  %p1717_p6 = por %p1716_p2, %p1715_p3 }
  0x69   : > { %p1718_p5 = pnand %p1717_p6, %p1711_p0 }
  0x6b   : > { %1721 = shalt.err (!%p1718_p5)
}
  0x6c   : > { %1535 = dma.hbm_to_vmem [thread:$0]  (!%p1958_p7), %s1965_s9, 128, %s502_s20, %s491_s18  }
  0x6d   : > { %p2262_p1 = scmp.ne.s32.totalorder %s2254_s25, 0 }
  0x6e   : > { %s512_s30 = sand.u32 (!%p2262_p1), 1, %s1760_s21   ;;  %p2263_p13 = scmp.ne.s32.totalorder (!%p2262_p1), %s2253_s24, 0 }
  0x6f   : > { %510 = sbr.rel (%p2262_p1) target bundleno = 1125 (0x465), region = 80  ;;  %s2016_s17 = sshll.u32 (!%p2262_p1), %s512_s30, 3 }
  0x70   : > { %s513_s13 = scalar_lea.sflag (!%p2262_p1), [#allocation4], %s512_s30  ;;  %s516_s15 = scalar_lea.vmem (!%p2262_p1), [#allocation3], %s2016_s17 }
  0x74   : > { %1739 = dma.done.wait (%p2263_p13), %s513_s13, 128  }
  0x75   : > { %1741 = vsyncadd (%p2263_p13), %s513_s13, 4294967168  ;;  %s521_s9 = sand.u32 1, %s1883_s14   ;;  %s525_s25 = scalar_lea.vmem [#allocation5], %s2016_s17 }
  0x76   : > { %s522_s29 = scalar_lea.sflag [#allocation6], %s521_s9 }
  0x77   : > { %1743 = dma.done.wait (%p2263_p13), %s522_s29, 128  }
  0x78   : > { %1745 = vsyncadd (%p2263_p13), %s522_s29, 4294967168  ;;  %p2264_p5 = scmp.eq.s32.totalorder %s1883_s14, 0 }
  0x7a   : > { %1747 = dma.done.wait (%p2264_p5), [#allocation6], 1536   ;;  %p2265_p7 = pmov %p2264_p5 }
  0x7b   : > { %p2266_p4 = pmov %p2264_p5 }
  0x7c   : > { %1749 = vsyncadd (%p2265_p7), [#allocation6], 4294965760 }
  0x7d   : > { %1751 = dma.done.wait (%p2266_p4), [#allocation9], 7168   ;;  %p2267_p8 = pmov %p2266_p4 }
  0x7e   : > { %v1779_v1 = vmov 0.0   ;;  %vm1780_vm0 = vmmov 0   ;;  %v604_v2 = vld [vmem:[%s2227_s2 + $0x58] sm:$0xff]  ;;  %v603_v3 = vld [vmem:[%s2227_s2 + $0x50] sm:$0xff]  ;;  %v602_v4 = vld [vmem:[%s2227_s2 + $0x48] sm:$0xff]  ;;  %vm701_vm1 = vcmask 392192  }
  0x7f   : > { %1753 = vsyncadd (%p2267_p8), [#allocation9], 4294960128  ;;  %1426 = vmatprep.subr.mxu0 %v1779_v1  ;;  %1453 = vmatprep.subr.mxu1 %v1779_v1  ;;  %v693_v5 = vld [vmem:[%s2229_s4 + $0x28] sm:$0xff]  ;;  %v692_v6 = vld [vmem:[%s2229_s4 + $0x20] sm:$0xff]  ;;  %vm612_vm2 = vcmask 785408   ;;  %s2268_s16 = sld [smem:[#allocation21_spill]] }
  0x80   : > { %1465 = vmatprep.mubr.msk.f32.mxu1 %vm1780_vm0, %v1779_v1  ;;  %1450 = vmatprep.mubr.msk.f32.mxu0 %vm1780_vm0, %v1779_v1  ;;  %v601_v7 = vld [vmem:[%s2227_s2 + $0x40] sm:$0xff]  ;;  %v691_v8 = vld [vmem:[%s2229_s4 + $0x18] sm:$0xff]  ;;  %v690_v10 = vld [vmem:[%s2229_s4 + $0x10] sm:$0xff]  ;;  %vm1188_vm3 = vcmask 130048   ;;  %p588_p9 = scmp.lt.s32.totalorder %s1883_s14, 1  ;;  %s2269_s19 = sld [smem:[#allocation22_spill]] }
  0x81   : > { %1427 = vmatpush3.msra.mxu0 %v604_v2  ;;  %1454 = vmatpush3.msra.mxu1 %v693_v5  ;;  %v600_v9 = vld [vmem:[%s2227_s2 + $0x38] sm:$0xff]  ;;  %v599_v11 = vld [vmem:[%s2227_s2 + $0x30] sm:$0xff]  ;;  %v689_v12 = vld [vmem:[%s2229_s4 + $0x8] sm:$0xff]  ;;  %vm1206_vm4 = vcmask 7168  }
  0x82   : > { %1428 = vmatprep.subr.mxu0 %v1779_v1  ;;  %1455 = vmatprep.subr.mxu1 %v1779_v1  ;;  %v598_v13 = vld [vmem:[%s2227_s2 + $0x28] sm:$0xff]  ;;  %v688_v14 = vld [vmem:[%s2229_s4] sm:$0xff]  ;;  %v810_v18 = vld [vmem:[#allocation8 + $0xb0] sm:$0xff]  ;;  %s2276_s14 = smov (!%p588_p9, %s1883_s14), 1 }
  0x83   : > { %1429 = vmatpush3.msra.mxu0 %v603_v3  ;;  %1456 = vmatpush3.msra.mxu1 %v692_v6  ;;  %v687_v15 = vld [vmem:[%s525_s25] sm:$0xff]  ;;  %v809_v20 = vld [vmem:[#allocation8 + $0xa8] sm:$0xff]  ;;  %v808_v21 = vld [vmem:[#allocation8 + $0xa0] sm:$0xff]  ;;  %s1340_s6 = sshll.u32 %s2276_s14, 3 }
  0x84   : > { %1430 = vmatprep.subr.mxu0 %v1779_v1  ;;  %1457 = vmatprep.subr.mxu1 %v1779_v1  ;;  %v597_v16 = vld [vmem:[%s2227_s2 + $0x20] sm:$0xff]  ;;  %v596_v19 = vld [vmem:[%s2227_s2 + $0x18] sm:$0xff]  ;;  %v595_v22 = vld [vmem:[%s2227_s2 + $0x10] sm:$0xff] }
  0x85   : > { %1431 = vmatpush3.msra.mxu0 %v602_v4  ;;  %1458 = vmatpush3.msra.mxu1 %v691_v8  ;;  %v811_v17 = vld [vmem:[#allocation8 + $0xb8] sm:$0xff]  ;;  %v806_v24 = vld [vmem:[#allocation8 + $0x90] sm:$0xff]  ;;  %v594_v25 = vld [vmem:[%s2227_s2 + $0x8] sm:$0xff] }
  0x86   : > { %1432 = vmatprep.subr.mxu0 %v1779_v1  ;;  %1459 = vmatprep.subr.mxu1 %v1779_v1  ;;  %v807_v23 = vld [vmem:[#allocation8 + $0x98] sm:$0xff]  ;;  %v805_v26 = vld [vmem:[#allocation8 + $0x88] sm:$0xff]  ;;  %v804_v27 = vld [vmem:[#allocation8 + $0x80] sm:$0xff]  ;;  %s591_s30 = scalar_lea.vmem %s2269_s19, %s1340_s6 }
  0x87   : > { %1433 = vmatpush3.msra.mxu0 %v601_v7  ;;  %1460 = vmatpush3.msra.mxu1 %v690_v10  ;;  %v593_v28 = vld [vmem:[%s2227_s2] sm:$0xff]  ;;  %v802_v31 = vld [vmem:[#allocation8 + $0x70] sm:$0xff]  ;;  %v801_v32 = vld [vmem:[#allocation8 + $0x68] sm:$0xff] }
  0x88   : > { %1434 = vmatprep.subr.mxu0 %v1779_v1  ;;  %1461 = vmatprep.subr.mxu1 %v1779_v1  ;;  %v803_v29 = vld [vmem:[#allocation8 + $0x78] sm:$0xff]  ;;  %v592_v30 = vld [vmem:[%s516_s15] sm:$0xff]  ;;  %v786_v35 = vld [vmem:[#allocation7 + $0x50] sm:$0xff] }
  0x89   : > { %1435 = vmatpush3.msra.mxu0 %v600_v9  ;;  %1462 = vmatpush3.msra.mxu1 %v689_v12  ;;  %v787_v33 = vld [vmem:[#allocation7 + $0x58] sm:$0xff]  ;;  %v800_v34 = vld [vmem:[#allocation8 + $0x60] sm:$0xff]  ;;  %v785_v37 = vld [vmem:[#allocation7 + $0x48] sm:$0xff] }
  0x8a   : > { %1436 = vmatprep.subr.mxu0 %v1779_v1  ;;  %1463 = vmatprep.subr.mxu1 %v1779_v1  ;;  %v799_v36 = vld [vmem:[#allocation8 + $0x58] sm:$0xff]  ;;  %v798_v38 = vld [vmem:[#allocation8 + $0x50] sm:$0xff]  ;;  %v784_v39 = vld [vmem:[#allocation7 + $0x40] sm:$0xff] }
  0x8b   : > { %1437 = vmatpush3.msra.mxu0 %v599_v11  ;;  %1464 = vmatpush3.msra.mxu1 %v688_v14  ;;  %v797_v40 = vld [vmem:[#allocation8 + $0x48] sm:$0xff]  ;;  %v783_v41 = vld [vmem:[#allocation7 + $0x38] sm:$0xff]  ;;  %v796_v42 = vld [vmem:[#allocation8 + $0x40] sm:$0xff] }
  0x8c   : > { %1438 = vmatprep.subr.mxu0 %v1779_v1  ;;  %1466 = vmatmul.mubr.msk.f32.vlgmr.msra.gmra.mxu1 %vm701_vm1, %v687_v15  ;;  %v782_v43 = vld [vmem:[#allocation7 + $0x30] sm:$0xff]  ;;  %v795_v44 = vld [vmem:[#allocation8 + $0x38] sm:$0xff]  ;;  %v781_v45 = vld [vmem:[#allocation7 + $0x28] sm:$0xff] }
  0x8d   : > { %1439 = vmatpush3.msra.mxu0 %v598_v13  ;;  %823 = vmatprep.subr.mxu1 %v811_v17  ;;  %v794_v46 = vld [vmem:[#allocation8 + $0x30] sm:$0xff]  ;;  %v780_v47 = vld [vmem:[#allocation7 + $0x20] sm:$0xff]  ;;  %v793_v48 = vld [vmem:[#allocation8 + $0x28] sm:$0xff] }
  0x8e   : > { %1440 = vmatprep.subr.mxu0 %v1779_v1  ;;  %824 = vmatpush1.msra.mxu1 %v810_v18  ;;  %v779_v49 = vld [vmem:[#allocation7 + $0x18] sm:$0xff]  ;;  %v792_v50 = vld [vmem:[#allocation8 + $0x20] sm:$0xff]  ;;  %v778_v51 = vld [vmem:[#allocation7 + $0x10] sm:$0xff] }
  0x8f   : > { %1441 = vmatpush3.msra.mxu0 %v597_v16  ;;  %825 = vmatprep.subr.mxu1 %v809_v20  ;;  %v791_v52 = vld [vmem:[#allocation8 + $0x18] sm:$0xff]  ;;  %v777_v53 = vld [vmem:[#allocation7 + $0x8] sm:$0xff]  ;;  %v790_v54 = vld [vmem:[#allocation8 + $0x10] sm:$0xff] }
  0x90   : > { %1442 = vmatprep.subr.mxu0 %v1779_v1  ;;  %826 = vmatpush1.msra.mxu1 %v808_v21  ;;  %v776_v55 = vld [vmem:[#allocation7] sm:$0xff]  ;;  %v789_v56 = vld [vmem:[#allocation8 + $0x8] sm:$0xff]  ;;  %v1007_v58 = vld [vmem:[#allocation10 + $0xf8] sm:$0xff] }
  0x91   : > { %1443 = vmatpush3.msra.mxu0 %v596_v19  ;;  %827 = vmatprep.subr.mxu1 %v807_v23  ;;  %v788_v57 = vld [vmem:[#allocation8] sm:$0xff]  ;;  %v1343_v59 = vld [vmem:[%s2230_s5] ss:$0 sm:$0xff]  ;;  %v1006_v2 = vld [vmem:[#allocation10 + $0xf0] sm:$0xff] }
  0x92   : > { %1444 = vmatprep.subr.mxu0 %v1779_v1  ;;  %828 = vmatpush1.msra.mxu1 %v806_v24  ;;  %v991_v0 = vld [vmem:[#allocation10 + $0x78] sm:$0xff]  ;;  %v990_v3 = vld [vmem:[#allocation10 + $0x70] sm:$0xff]  ;;  %v1005_v4 = vld [vmem:[#allocation10 + $0xe8] sm:$0xff] }
  0x93   : > { %1445 = vmatpush3.msra.mxu0 %v595_v22  ;;  %829 = vmatprep.subr.mxu1 %v805_v26  ;;  %v989_v5 = vld [vmem:[#allocation10 + $0x68] sm:$0xff]  ;;  %v1341_v6 = vld [vmem:[%s2228_s3] ss:$0 sm:$0xff]  ;;  %v1004_v7 = vld [vmem:[#allocation10 + $0xe0] sm:$0xff] }
  0x94   : > { %1446 = vmatprep.subr.mxu0 %v1779_v1  ;;  %830 = vmatpush1.msra.mxu1 %v804_v27  ;;  %v988_v8 = vld [vmem:[#allocation10 + $0x60] sm:$0xff]  ;;  %v1003_v10 = vld [vmem:[#allocation10 + $0xd8] sm:$0xff]  ;;  %v1002_v14 = vld [vmem:[#allocation10 + $0xd0] sm:$0xff] }
  0x95   : > { %1447 = vmatpush3.msra.mxu0 %v594_v25  ;;  %831 = vmatprep.subr.mxu1 %v803_v29  ;;  %v987_v12 = vld [vmem:[#allocation10 + $0x58] sm:$0xff]  ;;  %v986_v16 = vld [vmem:[#allocation10 + $0x50] sm:$0xff]  ;;  %v1001_v17 = vld [vmem:[#allocation10 + $0xc8] sm:$0xff] }
  0x96   : > { %1448 = vmatprep.subr.mxu0 %v1779_v1  ;;  %832 = vmatpush1.msra.mxu1 %v802_v31  ;;  %v985_v18 = vld [vmem:[#allocation10 + $0x48] sm:$0xff]  ;;  %v1000_v19 = vld [vmem:[#allocation10 + $0xc0] sm:$0xff]  ;;  %v999_v21 = vld [vmem:[#allocation10 + $0xb8] sm:$0xff] }
  0x97   : > { %1449 = vmatpush3.msra.mxu0 %v593_v28  ;;  %833 = vmatprep.subr.mxu1 %v801_v32  ;;  %v984_v20 = vld [vmem:[#allocation10 + $0x40] sm:$0xff]  ;;  %v983_v22 = vld [vmem:[#allocation10 + $0x38] sm:$0xff]  ;;  %v998_v23 = vld [vmem:[#allocation10 + $0xb0] sm:$0xff] }
  0x98   : > { %1451 = vmatmul.mubr.msk.f32.vlgmr.msra.gmra.mxu0 %vm612_vm2, %v592_v30  ;;  %909 = vmatprep.subr.mxu0 %v787_v33  ;;  %v982_v24 = vld [vmem:[#allocation10 + $0x30] sm:$0xff]  ;;  %v997_v25 = vld [vmem:[#allocation10 + $0xa8] sm:$0xff]  ;;  %v996_v27 = vld [vmem:[#allocation10 + $0xa0] sm:$0xff] }
  0x99   : > { %834 = vmatpush1.msra.mxu1 %v800_v34  ;;  %910 = vmatpush1.msra.mxu0 %v786_v35  ;;  %v981_v26 = vld [vmem:[#allocation10 + $0x28] sm:$0xff]  ;;  %v980_v28 = vld [vmem:[#allocation10 + $0x20] sm:$0xff]  ;;  %v995_v29 = vld [vmem:[#allocation10 + $0x98] sm:$0xff] }
  0x9a   : > { %835 = vmatprep.subr.mxu1 %v799_v36  ;;  %911 = vmatprep.subr.mxu0 %v785_v37  ;;  %v979_v30 = vld [vmem:[#allocation10 + $0x18] sm:$0xff]  ;;  %v994_v31 = vld [vmem:[#allocation10 + $0x90] sm:$0xff]  ;;  %v993_v33 = vld [vmem:[#allocation10 + $0x88] sm:$0xff] }
  0x9b   : > { %836 = vmatpush1.msra.mxu1 %v798_v38  ;;  %912 = vmatpush1.msra.mxu0 %v784_v39  ;;  %v978_v32 = vld [vmem:[#allocation10 + $0x10] sm:$0xff]  ;;  %v977_v34 = vld [vmem:[#allocation10 + $0x8] sm:$0xff]  ;;  %v992_v35 = vld [vmem:[#allocation10 + $0x80] sm:$0xff] }
  0x9c   : > { %837 = vmatprep.subr.mxu1 %v797_v40  ;;  %913 = vmatprep.subr.mxu0 %v783_v41  ;;  %v976_v36 = vld [vmem:[#allocation10] sm:$0xff]  ;;  %v1101_v37 = vld [vmem:[%s2236_s11 + $0x78] sm:$0xff]  ;;  %v1100_v38 = vld [vmem:[%s2236_s11 + $0x70] sm:$0xff] }
  0x9d   : > { %838 = vmatpush1.msra.mxu1 %v796_v42  ;;  %914 = vmatpush1.msra.mxu0 %v782_v43  ;;  %v1099_v39 = vld [vmem:[%s2236_s11 + $0x68] sm:$0xff]  ;;  %v1098_v40 = vld [vmem:[%s2236_s11 + $0x60] sm:$0xff]  ;;  %v1097_v41 = vld [vmem:[%s2236_s11 + $0x58] sm:$0xff] }
  0x9e   : > { %839 = vmatprep.subr.mxu1 %v795_v44  ;;  %915 = vmatprep.subr.mxu0 %v781_v45  ;;  %v1096_v42 = vld [vmem:[%s2236_s11 + $0x50] sm:$0xff]  ;;  %v1095_v43 = vld [vmem:[%s2236_s11 + $0x48] sm:$0xff]  ;;  %v1094_v44 = vld [vmem:[%s2236_s11 + $0x40] sm:$0xff] }
  0x9f   : > { %953 = vmatprep.mubr.f32.mxu0 %v1779_v1  ;;  %879 = vmatprep.mubr.f32.mxu1 %v1779_v1  ;;  %v1093_v45 = vld [vmem:[%s2236_s11 + $0x38] sm:$0xff] }
  0xa0   : > { %840 = vmatpush1.msra.mxu1 %v794_v46  ;;  %916 = vmatpush1.msra.mxu0 %v780_v47  ;;  %v1092_v46 = vld [vmem:[%s2236_s11 + $0x30] sm:$0xff]  ;;  %v1091_v47 = vld [vmem:[%s2236_s11 + $0x28] sm:$0xff] }
  0xa1   : > { %841 = vmatprep.subr.mxu1 %v793_v48  ;;  %917 = vmatprep.subr.mxu0 %v779_v49  ;;  %v962_v48 = vlaneseq }
  0xa2   : > { %842 = vmatpush1.msra.mxu1 %v792_v50  ;;  %918 = vmatpush1.msra.mxu0 %v778_v51  ;;  %v960_v51 = vld [vmem:[%s2233_s8] sm:$0x3] }
  0xa3   : > { %843 = vmatprep.subr.mxu1 %v791_v52  ;;  %919 = vmatprep.subr.mxu0 %v777_v53  ;;  %v963_v49 = vshrl.u32 %v962_v48, 7 }
  0xa4   : > { %844 = vmatpush1.msra.mxu1 %v790_v54  ;;  %920 = vmatpush1.msra.mxu0 %v776_v55 }
  0xa5   : > { %845 = vmatprep.subr.mxu1 %v789_v56  ;;  %1374 = vmatprep.subr.mxu0 %v1007_v58  ;;  %v964_v50 = vsub.s32 0, %v963_v49  ;;  %v968_v52 = vsub.s32 1, %v963_v49 }
  0xa6   : > { %846 = vmatpush1.msra.mxu1 %v788_v57 }
  0xa7   : > { %1468 = vmatprep.subr.mxu1 %v1779_v1  ;;  %v965_v55 = vrot.slane %v960_v51, %v964_v50  ;;  %v969_v57 = vrot.slane %v960_v51, %v968_v52 }
 0x14c   : > { %v771_v60 = vpop.f32.mrf.mxu1 }
 0x14d   : > { %v772_v61 = vadd.f32 %v1343_v59, %v771_v60 }
 0x14e   : > { %v1467_v62 = vpop.f32.mrf.mxu1 }
 0x14f   : > { %v775_v63 = vmax.f32 %v772_v61, 0.0 }
 0x151   : > { %1346 = vmatmul.mubr.msk.f32.vlgmr.msra.gmra.mxu0 %vm701_vm1, %v775_v63 }
 0x152   : > { %1375 = vmatpush3.msra.mxu0 %v991_v0 }
 0x153   : > { %1376 = vmatprep.subr.mxu0 %v1006_v2  ;;  %v1090_v2 = vld [vmem:[%s2236_s11 + $0x20] sm:$0xff] }
 0x154   : > { %1377 = vmatpush3.msra.mxu0 %v990_v3  ;;  %v1089_v3 = vld [vmem:[%s2236_s11 + $0x18] sm:$0xff] }
 0x155   : > { %1378 = vmatprep.subr.mxu0 %v1005_v4  ;;  %v1088_v4 = vld [vmem:[%s2236_s11 + $0x10] sm:$0xff] }
 0x156   : > { %1379 = vmatpush3.msra.mxu0 %v989_v5  ;;  %v1087_v5 = vld [vmem:[%s2236_s11 + $0x8] sm:$0xff] }
 0x157   : > { %1380 = vmatprep.subr.mxu0 %v1004_v7 }
 0x158   : > { %v682_v9 = vpop.f32.mrf.mxu0  ;;  %1381 = vmatpush3.msra.mxu0 %v988_v8  ;;  %v1347_v8 = vld [vmem:[%s2235_s10] ss:$0 sm:$0xff] }
 0x159   : > { %v683_v11 = vadd.f32 %v1341_v6, %v682_v9  ;;  %1382 = vmatprep.subr.mxu0 %v1003_v10  ;;  %v1086_v6 = vld [vmem:[%s2236_s11] sm:$0xff] }
 0x15a   : > { %v1452_v13 = vpop.f32.mrf.mxu0  ;;  %1383 = vmatpush3.msra.mxu0 %v987_v12 }
 0x15b   : > { %v686_v15 = vmax.f32 %v683_v11, 0.0  ;;  %1384 = vmatprep.subr.mxu0 %v1002_v14  ;;  %v1348_v13 = vld [vmem:[%s2237_s12] ss:$0 sm:$0xff] }
 0x15c   : > { %1385 = vmatpush3.msra.mxu0 %v986_v16  ;;  %v1349_v16 = vld [vmem:[%s2268_s16] ss:$0 sm:$0xff] }
 0x15d   : > { %1345 = vmatmul.mubr.msk.f32.vlgmr.msra.gmra.mxu1 %vm612_vm2, %v686_v15  ;;  %1386 = vmatprep.subr.mxu0 %v1001_v17 }
 0x15e   : > { %1500 = vmatprep.mubr.msk.f32.mxu1 %vm1780_vm0, %v1779_v1  ;;  %1387 = vmatpush3.msra.mxu0 %v985_v18 }
 0x15f   : > { %1388 = vmatprep.subr.mxu0 %v1000_v19  ;;  %1469 = vmatpush3.msra.mxu1 %v1101_v37 }
 0x160   : > { %1389 = vmatpush3.msra.mxu0 %v984_v20  ;;  %1470 = vmatprep.subr.mxu1 %v1779_v1  ;;  %v1350_v20 = vld [vmem:[#allocation2] ss:$0 sm:$0xff] }
 0x161   : > { %1390 = vmatprep.subr.mxu0 %v999_v21  ;;  %1471 = vmatpush3.msra.mxu1 %v1100_v38 }
 0x162   : > { %1391 = vmatpush3.msra.mxu0 %v983_v22  ;;  %1472 = vmatprep.subr.mxu1 %v1779_v1 }
 0x163   : > { %1392 = vmatprep.subr.mxu0 %v998_v23  ;;  %1473 = vmatpush3.msra.mxu1 %v1099_v39 }
 0x164   : > { %1393 = vmatpush3.msra.mxu0 %v982_v24  ;;  %1474 = vmatprep.subr.mxu1 %v1779_v1 }
 0x165   : > { %1394 = vmatprep.subr.mxu0 %v997_v25  ;;  %1475 = vmatpush3.msra.mxu1 %v1098_v40 }
 0x166   : > { %1395 = vmatpush3.msra.mxu0 %v981_v26  ;;  %1476 = vmatprep.subr.mxu1 %v1779_v1 }
 0x167   : > { %1396 = vmatprep.subr.mxu0 %v996_v27  ;;  %1477 = vmatpush3.msra.mxu1 %v1097_v41 }
 0x168   : > { %1397 = vmatpush3.msra.mxu0 %v980_v28  ;;  %1478 = vmatprep.subr.mxu1 %v1779_v1 }
 0x169   : > { %1398 = vmatprep.subr.mxu0 %v995_v29  ;;  %1479 = vmatpush3.msra.mxu1 %v1096_v42 }
 0x16a   : > { %1399 = vmatpush3.msra.mxu0 %v979_v30  ;;  %1480 = vmatprep.subr.mxu1 %v1779_v1 }
 0x16b   : > { %1400 = vmatprep.subr.mxu0 %v994_v31  ;;  %1481 = vmatpush3.msra.mxu1 %v1095_v43 }
 0x16c   : > { %1401 = vmatpush3.msra.mxu0 %v978_v32  ;;  %1482 = vmatprep.subr.mxu1 %v1779_v1 }
 0x16d   : > { %1402 = vmatprep.subr.mxu0 %v993_v33  ;;  %1483 = vmatpush3.msra.mxu1 %v1094_v44 }
 0x16e   : > { %1403 = vmatpush3.msra.mxu0 %v977_v34  ;;  %1484 = vmatprep.subr.mxu1 %v1779_v1 }
 0x16f   : > { %1404 = vmatprep.subr.mxu0 %v992_v35  ;;  %1485 = vmatpush3.msra.mxu1 %v1093_v45 }
 0x170   : > { %1405 = vmatpush3.msra.mxu0 %v976_v36  ;;  %1486 = vmatprep.subr.mxu1 %v1779_v1 }
 0x171   : > { %1487 = vmatpush3.msra.mxu1 %v1092_v46 }
 0x172   : > { %1488 = vmatprep.subr.mxu1 %v1779_v1 }
 0x173   : > { %1489 = vmatpush3.msra.mxu1 %v1091_v47 }
 0x174   : > { %1490 = vmatprep.subr.mxu1 %v1779_v1 }
 0x175   : > { %1491 = vmatpush3.msra.mxu1 %v1090_v2 }
 0x176   : > { %1492 = vmatprep.subr.mxu1 %v1779_v1 }
 0x177   : > { %1493 = vmatpush3.msra.mxu1 %v1089_v3 }
 0x178   : > { %1494 = vmatprep.subr.mxu1 %v1779_v1 }
 0x179   : > { %1495 = vmatpush3.msra.mxu1 %v1088_v4 }
 0x17a   : > { %1496 = vmatprep.subr.mxu1 %v1779_v1 }
 0x17b   : > { %1497 = vmatpush3.msra.mxu1 %v1087_v5 }
 0x17c   : > { %1498 = vmatprep.subr.mxu1 %v1779_v1 }
 0x17d   : > { %1499 = vmatpush3.msra.mxu1 %v1086_v6 }
 0x211   : > { %v955_v53 = vpop.f32.mrf.mxu0 }
 0x213   : > { %v957_v58 = vpop.f32.mrf.mxu0 }
 0x21d   : > { %v881_v54 = vpop.f32.mrf.mxu1 }
 0x21e   : > { %v956_v56 = vadd.f32 %v955_v53, %v881_v54 }
 0x21f   : > { %v883_v59 = vpop.f32.mrf.mxu1 }
 0x220   : > { %v958_v60 = vadd.f32 %v957_v58, %v883_v59  ;;  %v972_v61 = vadd.f32 %v965_v55, %v956_v56 }
 0x222   : > { %v973_v62 = vadd.f32 %v969_v57, %v958_v60  ;;  %v974_v0 = vmax.f32 %v972_v61, 0.0 }
 0x224   : > { %v975_v63 = vmax.f32 %v973_v62, 0.0 }
 0x226   : > { %1079 = vmatprep.mubr.f32.mxu0 %v975_v63 }
 0x227   : > { %1080 = vmatmul.mubr.f32.vlgmr.msra.gmra.mxu0 %v974_v0 }
 0x2e7   : > { %v1406_v7 = vpop.f32.mrf.mxu0 }
 0x2e9   : > { %v1407_v9 = vpop.f32.mrf.mxu0 }
 0x2ea   : > { %v1408_v10 = vadd.f32 %v1407_v9, %v1406_v7 }
 0x2ec   : > { %v1082_v11 = vadd.f32 %v1408_v10, %v1347_v8 }
 0x2ee   : > { %v1085_v12 = vmax.f32 %v1082_v11, 0.0 }
 0x2f0   : > { %1501 = vmatmul.mubr.f32.vlgmr.msra.gmra.mxu1 %v1085_v12 }
 0x3b0   : > { %v1175_v1 = vpop.f32.mrf.mxu1 }
 0x3b1   : > { %v1176_v14 = vadd.f32 %v1348_v13, %v1175_v1 }
 0x3b2   : > { %v1502_v15 = vpop.f32.mrf.mxu1 }
 0x3b3   : > { %v1179_v17 = vmax.f32 %v1176_v14, 0.0 }
 0x3b5   : > { %v1187_v18 = vmul.f32 %v1349_v16, %v1179_v17 }
 0x3b7   : > { %v1189_v19 = vsel %vm1188_vm3, %v1187_v18, 0.0 }
 0x3b8   : > { %1190 = vadd.xlane.f32.xlu0 %v1189_v19 }
 0x441   : > { %v1191_v21 = vpop.xlane.xlu0 %1190 }
 0x442   : > { %v1199_v22 = vadd.f32 %v1350_v20, %v1191_v21 }
 0x444   : > { %v1351_v23 = vmul.f32 -1.442695, %v1199_v22 }
 0x446   : > { %1584 = vpow2.f32 %v1351_v23 }
 0x453   : > { %v1585_v24 = vpop.eup %1584 }
 0x454   : > { %v1203_v25 = vadd.f32 1.0, %v1585_v24 }
 0x456   : > { %1586 = vrcp.f32 %v1203_v25 }
 0x463   : > { %v1587_v26 = vpop.eup %1586 }
 0x464   : > { %1207 = vst.msk [vmem:[%s591_s30] sm:$0xff] %vm1206_vm4, %v1587_v26 }
 0x465 PF: > { %s2270_s23 = sld [smem:[#allocation16_spill]]  ;;  %s2273_s20 = smov %s1760_s21 }
 0x466   : > { %s2271_s13 = sld [smem:[#allocation15_spill]] }
 0x467   : > { %s2272_s22 = sld [smem:[#allocation17_spill]] }
 0x46b   : > { %p31_p10 = scmp.ge.s32.totalorder %s2270_s23, 4  }
 0x46c   : > { %s2274_s21 = smov %s2271_s13 }
 0x46d   :  { %33 = sbr.rel (!%p31_p10) target bundleno = 12 (0xc), region = 145 }
 0x472   :  { %1227 = vsyncpa [#allocation4], 1 }
 0x473   :  { %1229 = vsyncpa [#allocation4 + $0x1], 1 }
 0x474   :  { %1230 = vsyncpa [#allocation6], 1 }
 0x475   :  { %1232 = vsyncpa [#allocation6 + $0x1], 1 }
 0x476   :  { %1233 = vsyncpa [#allocation9], 1 }

</bundles_post_ra>
